<compile_context>
chip_gen: v7x
topology: tpu7x:2x2x1
jax: 0.10.0
libtpu: 0.0.40
codegen_flags: <defaults>
</compile_context>

<pallas_src>
import jax
import jax.numpy as jnp
from jax.experimental import pallas as pl
from jax.experimental.pallas import tpu as pltpu

LATENT_SIZE = 128
NUM_CLASSES = 4
NUM_PROTOTYPES = 4
PROTOTYPE_SIZE = 50
BN_EPS = 1e-5        # nn.BatchNorm1d default eps
PROTO_EPS = 1e-5     # self.epsilon

# Row layout of the packed small-parameter array (shape (8, PROTOTYPE_SIZE)):
_ROW_PROTO = 0                      # rows [0, 4): prototypes (4, 50)
_ROW_GAMMA = NUM_PROTOTYPES         # row 4: BN gamma
_ROW_BETA = NUM_PROTOTYPES + 1      # row 5: BN beta
_ROW_B2 = NUM_PROTOTYPES + 2        # row 6: Linear(50,50) bias
_ROW_PSQ = NUM_PROTOTYPES + 3       # row 7: ||p||^2 in the first NUM_PROTOTYPES lanes
_PACK_ROWS = NUM_PROTOTYPES + 4     # = 8 (exactly one padded sublane tile)


def pppnet_kernel(x_ref, w1_ref, w2_ref, vec_ref, probs_ref, emb_ref):
    x = x_ref[...]                                   # (B, 128) f32

    # ---- main[0]: Linear(128 -> 50).  b1 omitted: the training-mode BatchNorm
    # below subtracts the batch mean, which cancels a constant per-feature bias
    # exactly, so the bias is a mathematical no-op on both outputs. ----
    h = jnp.dot(x, w1_ref[...], preferred_element_type=jnp.float32)

    # ---- main[1] + main[2]: BatchNorm1d(50) (training mode, biased batch var)
    # fused into a single scale/shift, then ReLU.  One pass over h for the
    # statistics, one fused mul/add/max pass to apply. ----
    gamma = vec_ref[_ROW_GAMMA:_ROW_GAMMA + 1, :]    # (1, 50)
    beta = vec_ref[_ROW_BETA:_ROW_BETA + 1, :]       # (1, 50)
    mean = jnp.mean(h, axis=0, keepdims=True)        # (1, 50)
    mean_sq = jnp.mean(h * h, axis=0, keepdims=True)
    var = jnp.maximum(mean_sq - mean * mean, 0.0)    # guard fp cancellation
    s = jax.lax.rsqrt(var + BN_EPS) * gamma
    t = beta - mean * s
    h = jnp.maximum(h * s + t, 0.0)                  # BN affine + ReLU fused

    # ---- main[3]: Linear(50 -> 50) ----
    b2 = vec_ref[_ROW_B2:_ROW_B2 + 1, :]             # (1, 50)
    z = jnp.dot(h, w2_ref[...], preferred_element_type=jnp.float32) + b2
    emb_ref[...] = z                                 # second output of forward()

    # ---- prototype layer: squared L2 distance to each prototype ----
    # l2s[b, k] = ||z_b||^2 + ||p_k||^2 - 2 z_b . p_k ; ||p||^2 precomputed in
    # the wrapper; clamp handles small negative values from fp cancellation.
    protos = vec_ref[_ROW_PROTO:_ROW_PROTO + NUM_PROTOTYPES, :]      # (4, 50)
    p_sq = vec_ref[_ROW_PSQ:_ROW_PSQ + 1, 0:NUM_PROTOTYPES]          # (1, 4)
    z_sq = jnp.sum(z * z, axis=1, keepdims=True)                     # (B, 1)
    cross = jnp.dot(z, protos.T, preferred_element_type=jnp.float32)  # (B, 4)
    l2s = jnp.maximum(z_sq + p_sq - 2.0 * cross, 0.0)

    # act = log((l2s + 1) / (l2s + eps)) written as a log difference so both
    # logs run on the (otherwise idle) EUP instead of a VPU divide + one log.
    act = jnp.log(l2s + 1.0) - jnp.log(l2s + PROTO_EPS)

    # ---- class linear: with NUM_PROTOTYPES == NUM_CLASSES and
    # incorrect_strength == 0.0, __make_linear_weights() builds the identity
    # matrix, so logits == act exactly; the (B,4)x(4,4) MXU trip is elided. ----
    logits = act

    # ---- softmax(dim=1); denominator reciprocal on the EUP ----
    m = jnp.max(logits, axis=1, keepdims=True)
    e = jnp.exp(logits - m)
    probs_ref[...] = e * pl.reciprocal(jnp.sum(e, axis=1, keepdims=True),
                                       approx=True)


def _pack_vec_params(params):
    """Pack prototypes, gamma, beta, b2 and precomputed ||p||^2 into one (8, 50) array."""
    p = params["prototypes"]                                         # (4, 50)
    p_sq = jnp.sum(p * p, axis=1)[None, :]                           # (1, 4)
    p_sq_row = jnp.pad(p_sq, ((0, 0), (0, PROTOTYPE_SIZE - NUM_PROTOTYPES)))
    pack = jnp.concatenate(
        [p, params["gamma"], params["beta"], params["b2"], p_sq_row], axis=0)
    assert pack.shape == (_PACK_ROWS, PROTOTYPE_SIZE)
    return pack


def pppnet_forward(x, params):
    B = x.shape[0]
    vec_pack = _pack_vec_params(params)
    vmem = pl.BlockSpec(memory_space=pltpu.MemorySpace.VMEM)
    probs, emb = pl.pallas_call(
        pppnet_kernel,
        out_shape=(
            jax.ShapeDtypeStruct((B, NUM_CLASSES), jnp.float32),
            jax.ShapeDtypeStruct((B, PROTOTYPE_SIZE), jnp.float32),
        ),
        in_specs=[vmem, vmem, vmem, vmem],
        out_specs=(vmem, vmem),
    )(x, params["w1"], params["w2"], vec_pack)
    return probs, emb


def pppnet_reference(x, params):
    """Pure-JAX reference matching the PyTorch forward (training-mode BN)."""
    h = x @ params["w1"]                              # b1 cancelled by BN below
    mean = jnp.mean(h, axis=0, keepdims=True)
    var = jnp.mean((h - mean) ** 2, axis=0, keepdims=True)
    h = (h - mean) / jnp.sqrt(var + BN_EPS) * params["gamma"] + params["beta"]
    h = jnp.maximum(h, 0.0)
    z = h @ params["w2"] + params["b2"]
    p = params["prototypes"]
    l2s = jnp.sum((z[:, None, :] - p[None, :, :]) ** 2, axis=-1)
    act = jnp.log((l2s + 1.0) / (l2s + PROTO_EPS))
    logits = act                                      # identity class-linear
    probs = jax.nn.softmax(logits, axis=1)
    return probs, z


def init_params(key):
    k1, k2, k3, k4, k5, k6 = jax.random.split(key, 6)
    # Linear(128, 50): weight stored transposed as (in, out) so kernel does x @ W.
    # The bias b1 is intentionally omitted (cancelled by training-mode BatchNorm).
    w1 = jax.random.normal(k1, (LATENT_SIZE, PROTOTYPE_SIZE), jnp.float32) * 0.05
    # BatchNorm1d(50) affine params (perturbed from the PyTorch defaults of
    # gamma=1, beta=0 purely so the test exercises the affine path).
    gamma = 1.0 + 0.1 * jax.random.normal(k2, (1, PROTOTYPE_SIZE), jnp.float32)
    beta = 0.1 * jax.random.normal(k3, (1, PROTOTYPE_SIZE), jnp.float32)
    # Linear(50, 50)
    w2 = jax.random.normal(k4, (PROTOTYPE_SIZE, PROTOTYPE_SIZE), jnp.float32) * 0.1
    b2 = jax.random.normal(k5, (1, PROTOTYPE_SIZE), jnp.float32) * 0.05
    # prototypes ~ randn
    prototypes = jax.random.normal(k6, (NUM_PROTOTYPES, PROTOTYPE_SIZE), jnp.float32)
    # Sanity: __make_linear_weights with NUM_PROTOTYPES == NUM_CLASSES and
    # incorrect_strength == 0.0 yields the identity, so the class-linear is elided.
    num_per_class = NUM_PROTOTYPES // NUM_CLASSES
    proto_class_id = jnp.zeros((NUM_PROTOTYPES, NUM_CLASSES), jnp.float32)
    proto_class_id = proto_class_id.at[
        jnp.arange(NUM_PROTOTYPES), jnp.arange(NUM_PROTOTYPES) // num_per_class
    ].set(1.0)
    assert bool(jnp.all(proto_class_id.T == jnp.eye(NUM_CLASSES)))
    return dict(w1=w1, gamma=gamma, beta=beta, w2=w2, b2=b2, prototypes=prototypes)


if __name__ == "__main__":
    key = jax.random.PRNGKey(0)
    pkey, xkey = jax.random.split(key)
    params = init_params(pkey)

    B = 8  # small batch; BatchNorm1d (training-mode stats) needs B > 1
    x = jax.random.normal(xkey, (B, LATENT_SIZE), jnp.float32)

    probs, emb = pppnet_forward(x, params)
    jax.block_until_ready((probs, emb))

    ref_probs, ref_emb = pppnet_reference(x, params)

    assert probs.shape == (B, NUM_CLASSES)
    assert emb.shape == (B, PROTOTYPE_SIZE)
    assert bool(jnp.all(jnp.isfinite(probs))) and bool(jnp.all(jnp.isfinite(emb)))
    # softmax rows must sum to ~1 (approx EUP reciprocal => loose tolerance)
    assert jnp.allclose(jnp.sum(probs, axis=1), 1.0, atol=5e-3)
    assert jnp.allclose(emb, ref_emb, atol=1e-3, rtol=1e-3)
    assert jnp.allclose(probs, ref_probs, atol=5e-3)
    print("KERNEL_OK")
</pallas_src>

<mosaic_0001>
module attributes {stable_mosaic.version = 11 : i64} {
  func.func @pppnet_kernel(%arg0: memref<8x128xf32, #tpu.memory_space<vmem>>, %arg1: memref<128x50xf32, #tpu.memory_space<vmem>>, %arg2: memref<50x50xf32, #tpu.memory_space<vmem>>, %arg3: memref<8x50xf32, #tpu.memory_space<vmem>>, %arg4: memref<8x4xf32, #tpu.memory_space<vmem>>, %arg5: memref<8x50xf32, #tpu.memory_space<vmem>>) attributes {dimension_semantics = [], scalar_prefetch = 0 : i64, scratch_operands = 0 : i64, tpu.core_type = #tpu.core_type<tc>} {
    %c0 = arith.constant 0 : index
    %c0_0 = arith.constant 0 : index
    %0 = vector.load %arg0[%c0, %c0_0] : memref<8x128xf32, #tpu.memory_space<vmem>>, vector<8x128xf32>
    %c0_1 = arith.constant 0 : index
    %c0_2 = arith.constant 0 : index
    %1 = vector.load %arg1[%c0_1, %c0_2] : memref<128x50xf32, #tpu.memory_space<vmem>>, vector<128x50xf32>
    %cst = arith.constant dense<0.000000e+00> : vector<8x50xf32>
    %2 = tpu.matmul %0, %1, %cst {dimension_numbers = #tpu.dot_dimension_numbers<[1], [0], [0], [1], [0, 0, 1, 1], [], []>} : vector<8x128xf32>, vector<128x50xf32>, vector<8x50xf32> -> vector<8x50xf32>
    %c4 = arith.constant 4 : index
    %c0_3 = arith.constant 0 : index
    %3 = vector.load %arg3[%c4, %c0_3] : memref<8x50xf32, #tpu.memory_space<vmem>>, vector<1x50xf32>
    %c5 = arith.constant 5 : index
    %c0_4 = arith.constant 0 : index
    %4 = vector.load %arg3[%c5, %c0_4] : memref<8x50xf32, #tpu.memory_space<vmem>>, vector<1x50xf32>
    %cst_5 = arith.constant dense<0.000000e+00> : vector<50xf32>
    %5 = vector.multi_reduction <add>, %2, %cst_5 [0] : vector<8x50xf32> to vector<50xf32>
    %6 = vector.shape_cast %5 : vector<50xf32> to vector<1x50xf32>
    %cst_6 = arith.constant 8.000000e+00 : f32
    %7 = vector.broadcast %cst_6 : f32 to vector<1x50xf32>
    %8 = arith.divf %6, %7 : vector<1x50xf32>
    %9 = arith.mulf %2, %2 : vector<8x50xf32>
    %cst_7 = arith.constant dense<0.000000e+00> : vector<50xf32>
    %10 = vector.multi_reduction <add>, %9, %cst_7 [0] : vector<8x50xf32> to vector<50xf32>
    %11 = vector.shape_cast %10 : vector<50xf32> to vector<1x50xf32>
    %cst_8 = arith.constant 8.000000e+00 : f32
    %12 = vector.broadcast %cst_8 : f32 to vector<1x50xf32>
    %13 = arith.divf %11, %12 : vector<1x50xf32>
    %14 = arith.mulf %8, %8 : vector<1x50xf32>
    %15 = arith.subf %13, %14 : vector<1x50xf32>
    %cst_9 = arith.constant 0.000000e+00 : f32
    %16 = vector.broadcast %cst_9 : f32 to vector<1x50xf32>
    %17 = arith.maximumf %15, %16 : vector<1x50xf32>
    %cst_10 = arith.constant 9.99999974E-6 : f32
    %18 = vector.broadcast %cst_10 : f32 to vector<1x50xf32>
    %19 = arith.addf %17, %18 : vector<1x50xf32>
    %20 = math.rsqrt %19 : vector<1x50xf32>
    %21 = arith.mulf %20, %3 : vector<1x50xf32>
    %22 = arith.mulf %8, %21 : vector<1x50xf32>
    %23 = arith.subf %4, %22 : vector<1x50xf32>
    %24 = vector.broadcast %21 : vector<1x50xf32> to vector<8x50xf32>
    %25 = arith.mulf %2, %24 : vector<8x50xf32>
    %26 = vector.broadcast %23 : vector<1x50xf32> to vector<8x50xf32>
    %27 = arith.addf %25, %26 : vector<8x50xf32>
    %cst_11 = arith.constant 0.000000e+00 : f32
    %28 = vector.broadcast %cst_11 : f32 to vector<8x50xf32>
    %29 = arith.maximumf %27, %28 : vector<8x50xf32>
    %c6 = arith.constant 6 : index
    %c0_12 = arith.constant 0 : index
    %30 = vector.load %arg3[%c6, %c0_12] : memref<8x50xf32, #tpu.memory_space<vmem>>, vector<1x50xf32>
    %c0_13 = arith.constant 0 : index
    %c0_14 = arith.constant 0 : index
    %31 = vector.load %arg2[%c0_13, %c0_14] : memref<50x50xf32, #tpu.memory_space<vmem>>, vector<50x50xf32>
    %cst_15 = arith.constant dense<0.000000e+00> : vector<8x50xf32>
    %32 = tpu.matmul %29, %31, %cst_15 {dimension_numbers = #tpu.dot_dimension_numbers<[1], [0], [0], [1], [0, 0, 1, 1], [], []>} : vector<8x50xf32>, vector<50x50xf32>, vector<8x50xf32> -> vector<8x50xf32>
    %33 = vector.broadcast %30 : vector<1x50xf32> to vector<8x50xf32>
    %34 = arith.addf %32, %33 : vector<8x50xf32>
    %c0_16 = arith.constant 0 : index
    %c0_17 = arith.constant 0 : index
    %35 = vector.load %arg5[%c0_16, %c0_17] : memref<8x50xf32, #tpu.memory_space<vmem>>, vector<8x50xf32>
    tpu.vector_store %arg5[%c0_16, %c0_17], %34 {strides = array<i32>} : memref<8x50xf32, #tpu.memory_space<vmem>>, vector<8x50xf32>,
    %c0_18 = arith.constant 0 : index
    %c0_19 = arith.constant 0 : index
    %36 = vector.load %arg3[%c0_18, %c0_19] : memref<8x50xf32, #tpu.memory_space<vmem>>, vector<4x50xf32>
    %c7 = arith.constant 7 : index
    %c0_20 = arith.constant 0 : index
    %37 = vector.load %arg3[%c7, %c0_20] : memref<8x50xf32, #tpu.memory_space<vmem>>, vector<1x4xf32>
    %38 = arith.mulf %34, %34 : vector<8x50xf32>
    %cst_21 = arith.constant dense<0.000000e+00> : vector<8xf32>
    %39 = vector.multi_reduction <add>, %38, %cst_21 [1] : vector<8x50xf32> to vector<8xf32>
    %40 = vector.shape_cast %39 : vector<8xf32> to vector<8x1xf32>
    %41 = tpu.transpose %36, [1, 0] : vector<4x50xf32> -> vector<50x4xf32>
    %cst_22 = arith.constant dense<0.000000e+00> : vector<8x4xf32>
    %42 = tpu.matmul %34, %41, %cst_22 {dimension_numbers = #tpu.dot_dimension_numbers<[1], [0], [0], [1], [0, 0, 1, 1], [], []>} : vector<8x50xf32>, vector<50x4xf32>, vector<8x4xf32> -> vector<8x4xf32>
    %43 = vector.broadcast %40 : vector<8x1xf32> to vector<8x4xf32>
    %44 = vector.broadcast %37 : vector<1x4xf32> to vector<8x4xf32>
    %45 = arith.addf %43, %44 : vector<8x4xf32>
    %cst_23 = arith.constant 2.000000e+00 : f32
    %46 = vector.broadcast %cst_23 : f32 to vector<8x4xf32>
    %47 = arith.mulf %46, %42 : vector<8x4xf32>
    %48 = arith.subf %45, %47 : vector<8x4xf32>
    %cst_24 = arith.constant 0.000000e+00 : f32
    %49 = vector.broadcast %cst_24 : f32 to vector<8x4xf32>
    %50 = arith.maximumf %48, %49 : vector<8x4xf32>
    %cst_25 = arith.constant 1.000000e+00 : f32
    %51 = vector.broadcast %cst_25 : f32 to vector<8x4xf32>
    %52 = arith.addf %50, %51 : vector<8x4xf32>
    %53 = math.log %52 : vector<8x4xf32>
    %cst_26 = arith.constant 9.99999974E-6 : f32
    %54 = vector.broadcast %cst_26 : f32 to vector<8x4xf32>
    %55 = arith.addf %50, %54 : vector<8x4xf32>
    %56 = math.log %55 : vector<8x4xf32>
    %57 = arith.subf %53, %56 : vector<8x4xf32>
    %cst_27 = arith.constant dense<0xFF800000> : vector<8xf32>
    %58 = vector.multi_reduction <maximumf>, %57, %cst_27 [1] : vector<8x4xf32> to vector<8xf32>
    %59 = vector.shape_cast %58 : vector<8xf32> to vector<8x1xf32>
    %60 = vector.broadcast %59 : vector<8x1xf32> to vector<8x4xf32>
    %61 = arith.subf %57, %60 : vector<8x4xf32>
    %62 = math.exp %61 : vector<8x4xf32>
    %cst_28 = arith.constant dense<0.000000e+00> : vector<8xf32>
    %63 = vector.multi_reduction <add>, %62, %cst_28 [1] : vector<8x4xf32> to vector<8xf32>
    %64 = vector.shape_cast %63 : vector<8xf32> to vector<8x1xf32>
    %65 = tpu.reciprocal %64 {approx = true} : vector<8x1xf32> -> vector<8x1xf32>
    %66 = vector.broadcast %65 : vector<8x1xf32> to vector<8x4xf32>
    %67 = arith.mulf %62, %66 : vector<8x4xf32>
    %c0_29 = arith.constant 0 : index
    %c0_30 = arith.constant 0 : index
    %68 = vector.load %arg4[%c0_29, %c0_30] : memref<8x4xf32, #tpu.memory_space<vmem>>, vector<8x4xf32>
    tpu.vector_store %arg4[%c0_29, %c0_30], %67 {strides = array<i32>} : memref<8x4xf32, #tpu.memory_space<vmem>>, vector<8x4xf32>,
    return
  }
}

</mosaic_0001>

<bundles_post_ra>
// kernel: tpu_custom_call.1
= control target key start
LH: loop header
LB: loop body
LE: loop exit
PB: predicated region body
PF: predicated region fallthrough
CT: control target
= control target key end

     0   :  { %v526_v3 = vmov 0.0|0.0   ;;  %vm527_vm0 = vmmov 0   ;;  %v528_v6 = vmov 0.0   ;;  %s680_s0 = inlined_call_operand.vmem [shape: f32[8,128], index: 0, kind: input, shape index: {}]   ;;  %s681_s1 = inlined_call_operand.vmem [shape: f32[128,50], index: 1, kind: input, shape index: {}]   ;;  %s682_s2 = inlined_call_operand.vmem [shape: f32[50,50], index: 2, kind: input, shape index: {}]   ;;  %s683_s3 = inlined_call_operand.vmem [shape: f32[8,50], index: 3, kind: input, shape index: {}]   ;;  %s684_s4 = inlined_call_operand.vmem [shape: f32[8,4], index: 4, kind: output, shape index: {0}]   ;;  %s685_s5 = inlined_call_operand.hbm [shape: f32[8,50], index: 5, kind: output, shape index: {1}]  }
   0x1   :  { %v21_v0 = vld [vmem:[%s681_s1] sm:$0xff]  ;;  %v22_v1 = vld [vmem:[%s681_s1 + $0x8] sm:$0xff]  ;;  %v23_v2 = vld [vmem:[%s681_s1 + $0x10] sm:$0xff]  ;;  %455 = vmatprep.subr.bf16.mxu0 %v526_v3  ;;  %430 = vmatprep.mubr.msk.f32.mxu0 %vm527_vm0, %v528_v6 }
   0x2   :  { %v456_v4 = vpack.c.bf16 %v22_v1, %v21_v0  ;;  %v24_v5 = vld [vmem:[%s681_s1 + $0x18] sm:$0xff]  ;;  %479 = vmatprep.subr.bf16.mxu1 %v526_v3  ;;  %447 = vmatprep.mubr.msk.f32.mxu1 %vm527_vm0, %v528_v6  ;;  %v25_v8 = vld [vmem:[%s681_s1 + $0x20] sm:$0xff]  ;;  %v26_v9 = vld [vmem:[%s681_s1 + $0x28] sm:$0xff] }
   0x3   :  { %v459_v7 = vpack.c.bf16 %v24_v5, %v23_v2 }
   0x4   :  { %457 = vmatpush3.bf16.msra.mxu0 %v456_v4 }
   0x5   :  { %458 = vmatprep.subr.bf16.mxu0 %v526_v3 }
   0x6   :  { %11 = vsyncpa [#allocation3], 0  ;;  %v462_v10 = vpack.c.bf16 %v26_v9, %v25_v8  ;;  %v27_v11 = vld [vmem:[%s681_s1 + $0x30] sm:$0xff]  ;;  %v28_v12 = vld [vmem:[%s681_s1 + $0x38] sm:$0xff]  ;;  %vm162_vm1 = vcmask 1041408   ;;  %vm109_vm2 = vcmask 408576   ;;  %v136_v60 = vlaneseq }
   0x7   :  { %v465_v13 = vpack.c.bf16 %v28_v12, %v27_v11  ;;  %v29_v14 = vld [vmem:[%s681_s1 + $0x40] sm:$0xff]  ;;  %v30_v15 = vld [vmem:[%s681_s1 + $0x48] sm:$0xff]  ;;  %v31_v17 = vld [vmem:[%s681_s1 + $0x50] sm:$0xff]  ;;  %vm334_vm3 = vcmask 31744  }
   0x8   :  { %460 = vmatpush3.bf16.msra.mxu0 %v459_v7  ;;  %v468_v16 = vpack.c.bf16 %v30_v15, %v29_v14  ;;  %v32_v18 = vld [vmem:[%s681_s1 + $0x58] sm:$0xff]  ;;  %v33_v20 = vld [vmem:[%s681_s1 + $0x60] sm:$0xff]  ;;  %v34_v21 = vld [vmem:[%s681_s1 + $0x68] sm:$0xff]  ;;  %v137_v61 = vshrl.u32 %v136_v60, 7 }
   0x9   :  { %461 = vmatprep.subr.bf16.mxu0 %v526_v3  ;;  %v471_v19 = vpack.c.bf16 %v32_v18, %v31_v17  ;;  %v474_v22 = vpack.c.bf16 %v34_v21, %v33_v20  ;;  %v35_v23 = vld [vmem:[%s681_s1 + $0x70] sm:$0xff]  ;;  %v36_v24 = vld [vmem:[%s681_s1 + $0x78] sm:$0xff]  ;;  %v20_v26 = vld [vmem:[%s680_s0] sm:$0xff] }
   0xa   :  { %v477_v25 = vpack.c.bf16 %v36_v24, %v35_v23  ;;  %v148_v27 = vld [vmem:[%s682_s2] sm:$0xff]  ;;  %v149_v28 = vld [vmem:[%s682_s2 + $0x8] sm:$0xff]  ;;  %v150_v30 = vld [vmem:[%s682_s2 + $0x10] sm:$0xff]  ;;  %v138_v63 = vsub.s32 0, %v137_v61 }
   0xb   :  { %v480_v29 = vpack.c.bf16 %v149_v28, %v148_v27  ;;  %v151_v31 = vld [vmem:[%s682_s2 + $0x18] sm:$0xff]  ;;  %v152_v33 = vld [vmem:[%s682_s2 + $0x20] sm:$0xff]  ;;  %v153_v34 = vld [vmem:[%s682_s2 + $0x28] sm:$0xff] }
   0xc   :  { %463 = vmatpush3.bf16.msra.mxu0 %v462_v10  ;;  %v483_v32 = vpack.c.bf16 %v151_v31, %v150_v30  ;;  %v486_v35 = vpack.c.bf16 %v153_v34, %v152_v33  ;;  %v154_v36 = vld [vmem:[%s682_s2 + $0x30] sm:$0x3]  ;;  %v107_v62 = vld [vmem:[%s683_s3 + $0x4] sm:$0x1]  ;;  %v108_v2 = vld [vmem:[%s683_s3 + $0x5] sm:$0x1] }
   0xd   :  { %464 = vmatprep.subr.bf16.mxu0 %v526_v3  ;;  %481 = vmatpush3.bf16.msra.mxu1 %v480_v29  ;;  %v237_v11 = vld [vmem:[%s683_s3] sm:$0xf]  ;;  %v365_v12 = vld [vmem:[%s683_s3 + $0x6] ss:$0 sm:$0xff]  ;;  %v370_v18 = vld [vmem:[%s683_s3 + $0x7] ss:$0 sm:$0xff] }
   0xe   :  { %482 = vmatprep.subr.bf16.mxu1 %v526_v3  ;;  %s529_s3 = smov [#allocation2]  }
   0xf   :  { %s355_s23 = sshll.u32 %s529_s3, 4  ;;  %s356_s23 = int_to_ptr.vmem [resolvable:$true] %s355_s23 }
  0x10   :  { %466 = vmatpush3.bf16.msra.mxu0 %v465_v13  ;;  %s502_s24 = scalar_lea.vmem %s356_s23, 128  ;;  %p507_p1 = scmp.lt.s32.totalorder %s356_s23, %s356_s23 }
  0x11   :  { %467 = vmatprep.subr.bf16.mxu0 %v526_v3  ;;  %484 = vmatpush3.bf16.msra.mxu1 %v483_v32  ;;  %p503_p0 = scmp.ne.s32.totalorder %s356_s23, %s502_s24  ;;  %p508_p2 = scmp.lt.s32.totalorder %s502_s24, %s502_s24 }
  0x12   :  { %485 = vmatprep.subr.bf16.mxu1 %v526_v3 }
  0x13   :  { %p509_p3 = por %p508_p2, %p507_p1 }
  0x14   :  { %469 = vmatpush3.bf16.msra.mxu0 %v468_v16 }
  0x15   :  { %470 = vmatprep.subr.bf16.mxu0 %v526_v3  ;;  %487 = vmatpush3.bf16.msra.mxu1 %v486_v35  ;;  %p510_p4 = pnand %p509_p3, %p503_p0 }
  0x16   :  { %445 = vmatprep.subr.mxu1 %v528_v6 }
  0x18   :  { %472 = vmatpush3.bf16.msra.mxu0 %v471_v19 }
  0x19   :  { %473 = vmatprep.subr.bf16.mxu0 %v526_v3  ;;  %446 = vmatpush3.msk.msra.mxu1 %vm162_vm1, %v154_v36 }
  0x1a   :  { %450 = vmatprep.subr.mxu1 %v528_v6 }
  0x1c   :  { %475 = vmatpush3.bf16.msra.mxu0 %v474_v22 }
  0x1d   :  { %476 = vmatprep.subr.bf16.mxu0 %v526_v3 }
  0x20   :  { %478 = vmatpush3.bf16.msra.mxu0 %v477_v25 }
  0x23   :  { %431 = vmatmul.mubr.f32.vlgmr.msra.gmra.mrb[0].mxu0 %v20_v26 }
  0xf6   :  { %v103_v37 = vpop.f32.mrb[0].mxu0 }
  0xf7   :  { %v110_v38 = vsel %vm109_vm2, %v103_v37, 0.0  ;;  %v119_v39 = vmul.f32 %v103_v37, %v103_v37  ;;  %v432_v40 = vpop.f32.mrb[1].mxu0 }
  0xf8   :  { %v111_v41 = vrot.slane %v110_v38, 4 }
  0xf9   :  { %v120_v42 = vsel %vm109_vm2, %v119_v39, 0.0 }
  0xfa   :  { %v112_v43 = vadd.f32 %v111_v41, %v110_v38  ;;  %v121_v44 = vrot.slane %v120_v42, 4 }
  0xfc   :  { %v113_v45 = vrot.slane %v112_v43, 2  ;;  %v122_v46 = vadd.f32 %v121_v44, %v120_v42 }
  0xfe   :  { %v114_v47 = vadd.f32 %v113_v45, %v112_v43  ;;  %v123_v48 = vrot.slane %v122_v46, 2 }
 0x100   :  { %v115_v49 = vrot.slane %v114_v47, 1  ;;  %v124_v50 = vadd.f32 %v123_v48, %v122_v46 }
 0x102   :  { %v116_v51 = vadd.f32 %v115_v49, %v114_v47  ;;  %v125_v52 = vrot.slane %v124_v50, 1 }
 0x104   :  { %v118_v53 = vmul.f32 0.125, %v116_v51  ;;  %v126_v54 = vadd.f32 %v125_v52, %v124_v50 }
 0x106   :  { %v127_v55 = vmul.f32 0.125, %v126_v54  ;;  %v128_v56 = vmul.f32 %v118_v53, %v118_v53 }
 0x108   :  { %v129_v57 = vsub.f32 %v127_v55, %v128_v56 }
 0x10a   :  { %v130_v58 = vmax.f32 %v129_v57, 0.0 }
 0x10c   :  { %v131_v59 = vadd.f32 1e-05, %v130_v58 }
 0x10e   :  { %492 = vrsqrt.f32 %v131_v59 }
 0x118   :  { %v493_v0 = vpop.eup %492 }
 0x119   :  { %v133_v1 = vmul.f32 %v493_v0, %v107_v62 }
 0x11b   :  { %v134_v3 = vmul.f32 %v133_v1, %v118_v53  ;;  %v139_v4 = vrot.slane %v133_v1, %v138_v63 }
 0x11d   :  { %v135_v5 = vsub.f32 %v108_v2, %v134_v3  ;;  %v140_v7 = vmul.f32 %v139_v4, %v103_v37 }
 0x11f   :  { %v144_v8 = vrot.slane %v135_v5, %v138_v63 }
 0x121   :  { %v145_v9 = vadd.f32 %v144_v8, %v140_v7 }
 0x123   :  { %v146_v10 = vmax.f32 %v145_v9, 0.0 }
 0x125   :  { %448 = vmatmul.mubr.msk.f32.vlgmr.msra.gmra.mrb[0].mxu1 %vm109_vm2, %v146_v10 }
 0x126   :  { %451 = vmatpush3.xpose.msk.msra.mxu1 %vm109_vm2, %v237_v11  ;;  %452 = vmatprep.mubr.msk.f32.mxu1 %vm527_vm0, %v528_v6 }
 0x1f8   :  { %v232_v13 = vpop.f32.mrb[0].mxu1 }
 0x1f9   :  { %v233_v14 = vadd.f32 %v365_v12, %v232_v13  ;;  %v449_v15 = vpop.f32.mrb[1].mxu1 }
 0x1fb   :  { %236 = vst.msk [vmem:[#allocation2] sm:$0xff] %vm109_vm2, %v233_v14  ;;  %453 = vmatmul.mubr.msk.f32.vlgmr.msra.gmra.mrb[2].mxu1 %vm109_vm2, %v233_v14  ;;  %v239_v16 = vmul.f32 %v233_v14, %v233_v14 }
 0x1fd   :  { %v240_v17 = vsel %vm109_vm2, %v239_v16, 0.0 }
 0x1fe   :  { %241 = vadd.xlane.f32.xlu0 %v240_v17 }
 0x28b   :  { %v242_v6 = vpop.xlane.xlu0 %241 }
 0x28c   :  { %v323_v20 = vadd.f32 %v370_v18, %v242_v6 }
 0x2ce   :  { %v315_v19 = vpop.f32.mrb[2].mxu1 }
 0x2cf   :  { %v324_v21 = vmul.f32 2.0, %v315_v19  ;;  %v454_v22 = vpop.f32.mrb[3].mxu1 }
 0x2d1   :  { %v325_v23 = vsub.f32 %v323_v20, %v324_v21 }
 0x2d3   :  { %v326_v24 = vmax.f32 %v325_v23, 0.0 }
 0x2d5   :  { %v327_v25 = vadd.f32 1.0, %v326_v24  ;;  %v330_v26 = vadd.f32 1e-05, %v326_v24 }
 0x2d7   :  { %494 = vlog2.f32 %v327_v25 }
 0x2d8   :  { %496 = vlog2.f32 %v330_v26 }
 0x2e1   :  { %v495_v27 = vpop.eup %494 }
 0x2e2   :  { %v497_v28 = vpop.eup %496  ;;  %v329_v29 = vmul.f32 0.6931472, %v495_v27 }
 0x2e3   :  { %v332_v30 = vmul.f32 0.6931472, %v497_v28 }
 0x2e5   :  { %v333_v31 = vsub.f32 %v329_v29, %v332_v30 }
 0x2e7   :  { %v335_v32 = vsel %vm334_vm3, %v333_v31, -inf }
 0x2e8   :  { %336 = vmax.xlane.f32.xlu0 %v335_v32 }
 0x375   :  { %v337_v33 = vpop.xlane.xlu0 %336 }
 0x376   :  { %v338_v34 = vsub.f32 %v333_v31, %v337_v33 }
 0x378   :  { %v339_v35 = vmul.f32 1.442695, %v338_v34 }
 0x37a   :  { %498 = vpow2.f32 %v339_v35 }
 0x384   :  { %v499_v36 = vpop.eup %498 }
 0x385   :  { %v341_v37 = vsel %vm334_vm3, %v499_v36, 0.0 }
 0x386   :  { %342 = vadd.xlane.f32.xlu1 %v341_v37 }
 0x387   :  { %513 = shalt.err (!%p510_p4)
}
 0x388   :  { %s514_s27 = scalar_lea.hbm %s685_s5, 128 }
 0x389   :  { %p515_p5 = scmp.ne.s32.totalorder %s685_s5, %s514_s27  ;;  %p518_p6 = scmp.lt.u32.totalorder %s514_s27, %s685_s5 }
 0x38b   :  { %p520_p7 = pnand %p518_p6, %p515_p5 }
 0x38d   :  { %523 = shalt.err (!%p520_p7)
}
 0x38e   :  { %358 = dma.vmem_to_hbm [thread:$0]  %s356_s23, 128, %s685_s5, [#allocation3]  }
 0x413   :  { %v343_v38 = vpop.xlane.xlu1 %342 }
 0x414   :  { %500 = vrcp.f32 %v343_v38 }
 0x41e   :  { %v501_v39 = vpop.eup %500 }
 0x41f   :  { %v345_v40 = vmul.f32 %v501_v39, %v499_v36 }
 0x421   :  { %346 = vst.msk [vmem:[%s684_s4] sm:$0xff] %vm334_vm3, %v345_v40 }
 0x422   :  { %524 = dma.done.wait [#allocation3], 128  }
 0x423   :  { %525 = vsyncadd [#allocation3], 4294967168 }
 0x424   :  { %364 = vsyncpa [#allocation3], 1 }

</bundles_post_ra>
